<compile_context>
chip_gen: v7x
topology: tpu7x:2x2x1
jax: 0.10.0
libtpu: 0.0.40
codegen_flags: <defaults>
</compile_context>

<pallas_src>
import functools

import jax
import jax.numpy as jnp
from jax.experimental import pallas as pl
from jax.experimental.pallas import tpu as pltpu


# ----------------------------------------------------------------------------
# Chip-aware VMEM budgeting / tiling helpers
# ----------------------------------------------------------------------------
def _scoped_vmem_bytes() -> int:
    """Scoped-VMEM limit requested from Mosaic (<= half physical VMEM)."""
    phys = 64 << 20  # conservative default: v7x physical VMEM per TensorCore
    try:
        info = pltpu.get_tpu_info()
        phys = int(getattr(info, "vmem_capacity_bytes", phys))
    except Exception:
        pass
    return min(max(phys // 2, 16 << 20), 64 << 20)


def _mosaic_params(*dimension_semantics):
    return pltpu.CompilerParams(
        dimension_semantics=dimension_semantics,
        vmem_limit_bytes=_scoped_vmem_bytes())


def _pick_spatial_tile(hw: int, n_parallel: int, bytes_per_col: int,
                       budget_bytes: int) -> int:
    """Largest spatial tile (multiple of 256, else 128) dividing `hw` whose
    per-grid-step VMEM footprint (~ bytes_per_col * thw, double-buffering
    already folded into bytes_per_col) fits in `budget_bytes`."""
    assert hw % 128 == 0, (
        "H*W must be a multiple of 128; pad the feature map (TODO(synk))")
    cap = min(hw, max(128, (budget_bytes // max(bytes_per_col, 1)) // 128 * 128))
    t = None
    for gran in (256, 128):  # 256-lane multiples align with the v6e/v7x MXU
        c = (cap // gran) * gran
        while c >= gran:
            if hw % c == 0:
                t = c
                break
            c -= gran
        if t is not None:
            break
    if t is None:
        t = 128
    # v7x megacore: prefer >= 2 grid steps over the parallel axes when possible.
    if n_parallel * (hw // t) < 2:
        for cand in (t // 2, t // 4):
            if cand >= 128 and cand % 128 == 0 and hw % cand == 0:
                t = cand
                break
    return t


def _pick_row_tile(rows: int, budget_bytes: int) -> int:
    """Row tile for an (rows, 128) f32 slab, double-buffered in + out."""
    cap = max(8, budget_bytes // (4 * 128 * 4))
    if rows <= cap:
        return rows
    t = (cap // 8) * 8
    while t >= 8:                      # sublane-dense (multiple of 8) divisor
        if rows % t == 0:
            return t
        t -= 8
    t = cap                            # fallback: any divisor within budget
    while t >= 1:
        if rows % t == 0:
            return t
        t -= 1
    return rows


def _reduce_channels(g, reduction: str):
    if reduction == "sum":
        return jnp.sum(g, axis=0, keepdims=True)
    if reduction == "mean":
        return jnp.mean(g, axis=0, keepdims=True)
    if reduction == "max":
        return jnp.max(g, axis=0, keepdims=True)
    if reduction == "norm":
        return jnp.sqrt(jnp.sum(g * g, axis=0, keepdims=True))
    raise ValueError(f"unknown reduction: {reduction!r}")


def _minmax_partials(r):
    # One packed (2, 128) block: row 0 = block min, row 1 = block max.
    return jnp.concatenate(
        [jnp.full((1, 128), jnp.min(r), jnp.float32),
         jnp.full((1, 128), jnp.max(r), jnp.float32)], axis=0)


# ----------------------------------------------------------------------------
# 1) Wrapped model forward: 1x1 conv + ReLU (NCHW, lane-dense over H*W)
# ----------------------------------------------------------------------------
def _pwconv_relu_kernel(x_ref, w_ref, b_ref, y_ref):
    # x_ref: (Cin, thw)  w_ref: (Cout, Cin)  b_ref: (Cout, 1)  y_ref: (Cout, thw)
    y = jnp.dot(w_ref[...], x_ref[...], preferred_element_type=jnp.float32)
    y_ref[...] = jnp.maximum(y + b_ref[...], 0.0).astype(y_ref.dtype)


def model_forward(x_nchw, w, b):
    """x_nchw: [N, Cin, H, W]; w: [Cin, Cout]; b: [Cout] -> [N, Cout, H, W]."""
    N, Cin, H, W = x_nchw.shape
    Cout = w.shape[1]
    HW = H * W
    budget = int(0.75 * _scoped_vmem_bytes())
    thw = _pick_spatial_tile(HW, N, 8 * (Cin + Cout), budget)
    T = HW // thw

    x3 = x_nchw.reshape(N, Cin, HW)                  # free reshape, stays NCHW
    out3 = pl.pallas_call(
        _pwconv_relu_kernel,
        out_shape=jax.ShapeDtypeStruct((N, Cout, HW), jnp.float32),
        grid=(N, T),
        in_specs=[
            pl.BlockSpec((None, Cin, thw), lambda n, t: (n, 0, t)),
            pl.BlockSpec((Cout, Cin), lambda n, t: (0, 0)),
            pl.BlockSpec((Cout, 1), lambda n, t: (0, 0)),
        ],
        out_specs=pl.BlockSpec((None, Cout, thw), lambda n, t: (n, 0, t)),
        compiler_params=_mosaic_params("parallel", "parallel"),
    )(x3, jnp.transpose(w), b.reshape(Cout, 1))
    return out3.reshape(N, Cout, H, W)               # free reshape


# ----------------------------------------------------------------------------
# 1b) Fused forward + hook epilogue (demo path: grad_output == activations)
# ----------------------------------------------------------------------------
def _pwconv_relu_reduce_kernel(x_ref, w_ref, b_ref, y_ref, r_ref, mnmx_ref,
                               *, reduction):
    y = jnp.maximum(
        jnp.dot(w_ref[...], x_ref[...], preferred_element_type=jnp.float32)
        + b_ref[...], 0.0)
    y_ref[...] = y.astype(y_ref.dtype)
    r = _reduce_channels(y, reduction)               # (1, thw)
    r_ref[...] = r.astype(r_ref.dtype)
    mnmx_ref[...] = _minmax_partials(r)


def forward_with_fused_hook(x_nchw, w, b, reduction, height, width):
    """Forward pass + hook reduction fused: avoids re-reading (N,Cout,HW)."""
    N, Cin, H, W = x_nchw.shape
    Cout = w.shape[1]
    HW = H * W
    assert H == height and W == width  # TODO(synk): cv2.resize branch not kernelised
    budget = int(0.75 * _scoped_vmem_bytes())
    thw = _pick_spatial_tile(HW, N, 8 * (Cin + Cout + 1), budget)
    T = HW // thw

    x3 = x_nchw.reshape(N, Cin, HW)
    y3, r3, mnmx = pl.pallas_call(
        functools.partial(_pwconv_relu_reduce_kernel, reduction=reduction),
        out_shape=(
            jax.ShapeDtypeStruct((N, Cout, HW), jnp.float32),
            jax.ShapeDtypeStruct((N, 1, HW), jnp.float32),
            jax.ShapeDtypeStruct((N, T, 2, 128), jnp.float32),
        ),
        grid=(N, T),
        in_specs=[
            pl.BlockSpec((None, Cin, thw), lambda n, t: (n, 0, t)),
            pl.BlockSpec((Cout, Cin), lambda n, t: (0, 0)),
            pl.BlockSpec((Cout, 1), lambda n, t: (0, 0)),
        ],
        out_specs=(
            pl.BlockSpec((None, Cout, thw), lambda n, t: (n, 0, t)),
            pl.BlockSpec((None, 1, thw), lambda n, t: (n, 0, t)),
            pl.BlockSpec((None, None, 2, 128), lambda n, t: (n, t, 0, 0)),
        ),
        compiler_params=_mosaic_params("parallel", "parallel"),
    )(x3, jnp.transpose(w), b.reshape(Cout, 1))

    normalized3 = _finish_normalize(r3, mnmx)
    return y3.reshape(N, Cout, H, W), normalized3.reshape(N, H, W)


# ----------------------------------------------------------------------------
# 2a) Backward-hook: channel reduction (axis=1) + fused per-block min/max
# ----------------------------------------------------------------------------
def _channel_reduce_minmax_kernel(g_ref, r_ref, mnmx_ref, *, reduction):
    r = _reduce_channels(g_ref[...].astype(jnp.float32), reduction)
    r_ref[...] = r.astype(r_ref.dtype)               # (1, thw) lane-dense store
    mnmx_ref[...] = _minmax_partials(r)


def channel_reduce_minmax(grads_nchw, reduction):
    """[N,C,H,W] -> (reduced [N,1,H*W], packed min/max partials [N,T,2,128])."""
    N, C, H, W = grads_nchw.shape
    HW = H * W
    budget = int(0.75 * _scoped_vmem_bytes())
    thw = _pick_spatial_tile(HW, N, 8 * (C + 1), budget)
    T = HW // thw
    g3 = grads_nchw.reshape(N, C, HW)                # free reshape

    return pl.pallas_call(
        functools.partial(_channel_reduce_minmax_kernel, reduction=reduction),
        out_shape=(
            jax.ShapeDtypeStruct((N, 1, HW), jnp.float32),
            jax.ShapeDtypeStruct((N, T, 2, 128), jnp.float32),
        ),
        grid=(N, T),
        in_specs=[pl.BlockSpec((None, C, thw), lambda n, t: (n, 0, t))],
        out_specs=(
            pl.BlockSpec((None, 1, thw), lambda n, t: (n, 0, t)),
            pl.BlockSpec((None, None, 2, 128), lambda n, t: (n, t, 0, 0)),
        ),
        compiler_params=_mosaic_params("parallel", "parallel"),
    )(g3)


# ----------------------------------------------------------------------------
# 2b) Backward-hook: global min-max normalisation (sublane-dense slab)
# ----------------------------------------------------------------------------
def _minmax_normalize_kernel(s_ref, r_ref, o_ref):
    # s_ref: SMEM [gmin, inv_range]; r_ref/o_ref: (tr, 128) sublane-dense blocks.
    o_ref[...] = (r_ref[...] - s_ref[0]) * s_ref[1]


def _finish_normalize(reduced3, mnmx):
    """Global min-max normalise the reduced map. reduced3: [N,1,HW]."""
    N, _, HW = reduced3.shape
    # Combine the handful of per-block partials on the host: avoids a second
    # full HBM read of `reduced` just to compute global min/max.
    gmin = jnp.min(mnmx[:, :, 0, 0])
    gmax = jnp.max(mnmx[:, :, 1, 0])
    rng = gmax - gmin
    inv_range = jnp.where(rng > 0, 1.0 / rng, 0.0)   # guard constant maps (0/0 -> NaN)
    scalars = jnp.stack([gmin, inv_range]).astype(jnp.float32)  # [2] -> SMEM

    # Sublane-dense: (N*HW/128, 128) slab, full (8k,128) vregs per block
    # instead of 1-of-8-sublane (1, thw) blocks.
    R = N * HW // 128
    flat = reduced3.reshape(R, 128)                  # free reshape (contiguous)
    budget = int(0.75 * _scoped_vmem_bytes())
    tr = _pick_row_tile(R, budget)

    out = pl.pallas_call(
        _minmax_normalize_kernel,
        out_shape=jax.ShapeDtypeStruct((R, 128), jnp.float32),
        grid=(R // tr,),
        in_specs=[
            pl.BlockSpec(memory_space=pltpu.MemorySpace.SMEM),
            pl.BlockSpec((tr, 128), lambda i: (i, 0)),
        ],
        out_specs=pl.BlockSpec((tr, 128), lambda i: (i, 0)),
        compiler_params=_mosaic_params("parallel"),
    )(scalars, flat)
    return out.reshape(N, 1, HW)


def gradient_analysis_hook(grads_nchw, reduction, height, width):
    """Pallas equivalent of the backward-hook body (C > 1, no resize)."""
    N, C, H, W = grads_nchw.shape
    assert H == height and W == width  # TODO(synk): cv2.resize branch not kernelised
    # TODO(synk): the C == 1 branch of the hook squeezes instead of reducing;
    # demo shapes use C > 1 so that branch is not taken.
    reduced3, mnmx = channel_reduce_minmax(grads_nchw, reduction)
    return _finish_normalize(reduced3, mnmx).reshape(N, H, W)


# ----------------------------------------------------------------------------
if __name__ == "__main__":
    key = jax.random.PRNGKey(0)
    kx, kw, kb = jax.random.split(key, 3)

    N, Cin, H, W = 2, 4, 16, 16
    Cout = 8
    reduction = "mean"

    x = jax.random.normal(kx, (N, Cin, H, W), jnp.float32)
    w = 0.1 * jax.random.normal(kw, (Cin, Cout), jnp.float32)  # deterministic init
    b = 0.1 * jax.random.normal(kb, (Cout,), jnp.float32)

    # forward(): Gradient_Analysis.forward(x) == self.model(x)
    y = model_forward(x, w, b)

    # Fused demo path: with loss = 0.5*||y||^2 the layer grad_output equals y,
    # so the conv epilogue emits the hook's reduced map + min/max partials
    # without re-reading (N, Cout, H*W) from HBM.
    y_fused, normalized_fused = forward_with_fused_hook(x, w, b, reduction, H, W)

    # General hook path (arbitrary gradients), fed the same analytic gradient.
    # TODO(synk): register_backward_hook / autograd plumbing stays host-side.
    grads = y
    normalized = gradient_analysis_hook(grads, reduction, H, W)

    jax.block_until_ready((y, y_fused, normalized, normalized_fused))

    # pure-JAX reference check
    y_ref = jnp.maximum(
        jnp.einsum("nchw,cd->ndhw", x, w) + b[None, :, None, None], 0.0)
    r_ref = jnp.mean(y_ref, axis=1)
    n_ref = (r_ref - jnp.min(r_ref)) / (jnp.max(r_ref) - jnp.min(r_ref))

    assert y.shape == (N, Cout, H, W) and normalized.shape == (N, H, W)
    assert jnp.allclose(y, y_ref, atol=1e-4, rtol=1e-4)
    assert jnp.allclose(y_fused, y_ref, atol=1e-4, rtol=1e-4)
    assert jnp.allclose(normalized, n_ref, atol=1e-4, rtol=1e-4)
    assert jnp.allclose(normalized_fused, n_ref, atol=1e-4, rtol=1e-4)

    print("KERNEL_OK")
</pallas_src>

<mosaic_0001>
module attributes {stable_mosaic.version = 11 : i64} {
  func.func @_pwconv_relu_kernel(%arg0: i32, %arg1: i32, %arg2: memref<1x4x256xf32, #tpu.memory_space<vmem>>, %arg3: memref<8x4xf32, #tpu.memory_space<vmem>>, %arg4: memref<8x1xf32, #tpu.memory_space<vmem>>, %arg5: memref<1x8x256xf32, #tpu.memory_space<vmem>>) attributes {dimension_semantics = [#tpu.dimension_semantics<parallel>, #tpu.dimension_semantics<parallel>], iteration_bounds = array<i64: 2, 1>, scalar_prefetch = 0 : i64, scratch_operands = 0 : i64, tpu.core_type = #tpu.core_type<tc>, window_params = [{transform_indices = @transform_0, window_bounds = array<i64: 1, 4, 256>}, {pipeline_mode = #tpu.pipeline_mode<synchronous>, transform_indices = @transform_1, window_bounds = array<i64: 8, 4>}, {pipeline_mode = #tpu.pipeline_mode<synchronous>, transform_indices = @transform_2, window_bounds = array<i64: 8, 1>}, {transform_indices = @transform_3, window_bounds = array<i64: 1, 8, 256>}]} {
    %c0 = arith.constant 0 : index
    %c0_0 = arith.constant 0 : index
    %0 = vector.load %arg3[%c0, %c0_0] : memref<8x4xf32, #tpu.memory_space<vmem>>, vector<8x4xf32>
    %c0_1 = arith.constant 0 : index
    %c0_2 = arith.constant 0 : index
    %c0_3 = arith.constant 0 : index
    %1 = vector.load %arg2[%c0_1, %c0_2, %c0_3] : memref<1x4x256xf32, #tpu.memory_space<vmem>>, vector<1x4x256xf32>
    %2 = vector.shape_cast %1 : vector<1x4x256xf32> to vector<4x256xf32>
    %cst = arith.constant dense<0.000000e+00> : vector<8x256xf32>
    %3 = tpu.matmul %0, %2, %cst {dimension_numbers = #tpu.dot_dimension_numbers<[1], [0], [0], [1], [0, 0, 1, 1], [], []>} : vector<8x4xf32>, vector<4x256xf32>, vector<8x256xf32> -> vector<8x256xf32>
    %c0_4 = arith.constant 0 : index
    %c0_5 = arith.constant 0 : index
    %4 = vector.load %arg4[%c0_4, %c0_5] : memref<8x1xf32, #tpu.memory_space<vmem>>, vector<8x1xf32>
    %5 = vector.broadcast %4 : vector<8x1xf32> to vector<8x256xf32>
    %6 = arith.addf %3, %5 : vector<8x256xf32>
    %cst_6 = arith.constant 0.000000e+00 : f32
    %7 = vector.broadcast %cst_6 : f32 to vector<8x256xf32>
    %8 = arith.maximumf %6, %7 : vector<8x256xf32>
    %c0_7 = arith.constant 0 : index
    %c0_8 = arith.constant 0 : index
    %c0_9 = arith.constant 0 : index
    %9 = vector.load %arg5[%c0_7, %c0_8, %c0_9] : memref<1x8x256xf32, #tpu.memory_space<vmem>>, vector<1x8x256xf32>
    %10 = vector.shape_cast %9 : vector<1x8x256xf32> to vector<8x256xf32>
    %11 = vector.shape_cast %8 : vector<8x256xf32> to vector<1x8x256xf32>
    tpu.vector_store %arg5[%c0_7, %c0_8, %c0_9], %11 {strides = array<i32>} : memref<1x8x256xf32, #tpu.memory_space<vmem>>, vector<1x8x256xf32>,
    return
  }
  func.func @transform_0(%arg0: i32, %arg1: i32) -> (i32, i32, i32) {
    %c0_i32 = arith.constant 0 : i32
    %c0_i32_0 = arith.constant 0 : i32
    return %arg0, %c0_i32, %arg1 : i32, i32, i32
  }
  func.func @transform_1(%arg0: i32, %arg1: i32) -> (i32, i32) {
    %c0_i32 = arith.constant 0 : i32
    %c0_i32_0 = arith.constant 0 : i32
    %c0_i32_1 = arith.constant 0 : i32
    return %c0_i32, %c0_i32_0 : i32, i32
  }
  func.func @transform_2(%arg0: i32, %arg1: i32) -> (i32, i32) {
    %c0_i32 = arith.constant 0 : i32
    %c0_i32_0 = arith.constant 0 : i32
    %c0_i32_1 = arith.constant 0 : i32
    return %c0_i32, %c0_i32_0 : i32, i32
  }
  func.func @transform_3(%arg0: i32, %arg1: i32) -> (i32, i32, i32) {
    %c0_i32 = arith.constant 0 : i32
    %c0_i32_0 = arith.constant 0 : i32
    return %arg0, %c0_i32, %arg1 : i32, i32, i32
  }
}

</mosaic_0001>

<bundles_post_ra>
// kernel: tpu_custom_call.1
= control target key start
LH: loop header
LB: loop body
LE: loop exit
PB: predicated region body
PF: predicated region fallthrough
CT: control target
= control target key end

     0   :  { %8 = vsyncpa [#allocation3], 0  ;;  %s685_s0 = inlined_call_operand.vmem [shape: f32[2,4,256], index: 0, kind: input, shape index: {}]   ;;  %s686_s1 = inlined_call_operand.vmem [shape: f32[8,4], index: 1, kind: input, shape index: {}]   ;;  %s687_s2 = inlined_call_operand.vmem [shape: f32[8,1], index: 2, kind: input, shape index: {}]   ;;  %s688_s3 = inlined_call_operand.hbm [shape: f32[2,8,256], index: 3, kind: output, shape index: {}]  }
   0x1   :  { %10 = vsyncpa [#allocation3 + $0x1], 0  ;;  %s567_s12 = smov 0   ;;  %s569_s13 = smov 0  }
   0x2   :  { %s571_s14 = smov 0   ;;  %s573_s15 = smov 0  }
   0x3   :  { %s575_s16 = smov 0   ;;  %s577_s17 = smov 0  }
   0x4 LB: > { %s387_s18 = sadd.s32 4294967295, %s542_s17   ;;  %s388_s19 = sadd.s32 4294967294, %s542_s17   ;;  %s542_s17 = sphi %s577_s17, %s16_s17   ;;  %s538_s16 = sphi %s575_s16, %s695_s16   ;;  %s534_s15 = sphi %s573_s15, %s694_s15   ;;  %s530_s14 = sphi %s571_s14, %s693_s14   ;;  %s526_s13 = sphi %s569_s13, %s692_s13   ;;  %s522_s12 = sphi %s567_s12, %s691_s12  }
   0x5   : > { %s28_s20 = sadd.s32 1, %s538_s16  ;;  %s107_s21 = sadd.s32 1, %s530_s14 }
   0x6   : > { %p30_p0 = scmp.ge.s32.totalorder %s28_s20, 2  ;;  %p117_p1 = scmp.ne.s32.totalorder %s530_s14, %s526_s13 }
   0x7   : > { %p118_p2 = scmp.eq.s32.totalorder %s387_s18, 1  ;;  %p123_p3 = scmp.ne.s32.totalorder %s526_s13, %s522_s12 }
   0x8   : > { %s697_s20 = smov (%p30_p0, %s28_s20), 0  ;;  %p124_p5 = scmp.eq.s32.totalorder %s388_s19, 1 }
   0x9   : > { %p607_p4 = por %p118_p2, %p117_p1  ;;  %s102_s23 = ssub.s32 %s538_s16, %s697_s20 }
   0xa   : > { %p391_p6 = scmp.ge.s32.totalorder %s542_s17, 1  ;;  %p105_p7 = scmp.eq.s32.totalorder %s102_s23, 0 }
   0xb   : > { %p614_p8 = por %p124_p5, %p123_p3  ;;  %p161_p9 = scmp.lt.s32.totalorder %s542_s17, 3 }
   0xc   : > { %s620_s25 = scalar_select %p105_p7, %s530_s14, %s107_s21  }
   0xd   : > { %p162_p10 = pnand %p391_p6, %p161_p9 }
   0xe   : > { %p190_p11 = scmp.lt.s32.totalorder (!%p162_p10), %s534_s15, 1  ;;  %v544_v0 = vmov (!%p162_p10), 0.0   ;;  %v545_v1 = vmov (!%p162_p10), 0   ;;  %v202_v2 = vld [vmem:[%s687_s2] sm:$0xff] (!%p162_p10)  ;;  %vm214_vm0 = vcmask (!%p162_p10), 1043456   ;;  %vm210_vm1 = vcmask (!%p162_p10), 31744  }
   0xf   : > { %165 = sbr.rel (%p162_p10) target bundleno = 262 (0x106), region = 32  ;;  %283 = vmatprep.mubr.f32.mxu0 (!%p162_p10), %v544_v0  ;;  %462 = vset.pattern.permute.xlu0 (!%p162_p10), %v545_v1  ;;  %v200_v5 = vld [vmem:[%s686_s1] sm:$0xff] (!%p162_p10)  ;;  %s186_s8 = sand.u32 (!%p162_p10), 1, %s526_s13  }
  0x10   : > { %205 = vperm.xlu0 (!%p162_p10), %462, %v202_v2   ;;  %s392_s9 = sshll.u32 (!%p162_p10), %s186_s8, 4  ;;  %s404_s10 = sshll.u32 (!%p162_p10), %s534_s15, 8 }
  0x11   : > { %s188_s11 = scalar_lea.vmem (!%p162_p10), [#allocation2], %s392_s9  ;;  %s638_s23 = scalar_lea.hbm (!%p162_p10), %s688_s3, %s404_s10 }
  0x12   : > { %s311_s18 = sshll.u32 (!%p162_p10), %s188_s11, 4  ;;  %s295_s26 = scalar_lea.sflag (!%p162_p10), [#allocation3], %s186_s8  ;;  %s640_s18 = int_to_ptr.vmem [resolvable:$true] %s311_s18 }
  0x13   : > { %s464_s27 = scalar_lea.vmem (!%p162_p10), %s640_s18, 256 }
  0x14   : > { %p465_p12 = scmp.ne.s32.totalorder (!%p162_p10), %s640_s18, %s464_s27 }
  0x16   : > { %s191_s28 = scalar_select %p190_p11, %s534_s15, 1 }
  0x17   : > { %p466_p13 = pnand %p465_p12, %p607_p4  ;;  %s546_s15 = smov [#allocation2]  }
  0x18   : > { %s403_s29 = sshll.u32 %s191_s28, 3  ;;  %s468_s28 = sshll.u32 %s546_s15, 4  ;;  %s469_s28 = int_to_ptr.vmem [resolvable:$false] %s468_s28 }
  0x19   : > { %s197_s5 = scalar_lea.vmem %s685_s0, %s403_s29  ;;  %p467_p0 = pneg %p466_p13 }
  0x1a   : > { %v201_v3 = vld [vmem:[%s197_s5] sm:$0xff]  ;;  %s470_s29 = scalar_lea.vmem %s469_s28, 512  ;;  %p471_p1 = scmp.lt.s32.totalorder %s640_s18, %s469_s28 }
  0x1b   : > { %v209_v4 = vcombine.high %v201_v3, %v201_v3  ;;  %p472_p2 = scmp.lt.s32.totalorder %s470_s29, %s464_s27 }
  0x1d   : > { %395 = vmatprep.subr.msk.mxu0 %vm214_vm0, %v209_v4  ;;  %p473_p3 = por %p472_p2, %p471_p1 }
  0x1e   : > { %396 = vmatpush1.msk.msra.mxu0 %vm214_vm0, %v201_v3 }
  0x1f   : > { %397 = vmatmul.mubr.msk.f32.vlgmr.msra.gmra.mrb[0].mxu0 %vm210_vm1, %v200_v5  ;;  %p474_p5 = pnand %p473_p3, %p467_p0 }
  0x8f   : > { %v206_v6 = vpop.permute.xlu0 %205 }
  0xf2   : > { %v285_v7 = vpop.f32.mrb[0].mxu0 }
  0xf3   : > { %v286_v8 = vadd.f32 %v285_v7, %v206_v6  ;;  %v287_v9 = vpop.f32.mrb[1].mxu0 }
  0xf4   : > { %v288_v10 = vadd.f32 %v287_v9, %v206_v6 }
  0xf5   : > { %v290_v11 = vmax.f32 %v286_v8, 0.0 }
  0xf6   : > { %v291_v12 = vmax.f32 %v288_v10, 0.0 }
  0xf7   : > { %292 = vst [vmem:[%s188_s11] sm:$0xff] %v290_v11 }
  0xf8   : > { %293 = vst [vmem:[%s188_s11 + $0x8] sm:$0xff] %v291_v12 }
  0xf9   : > { %477 = shalt.err (!%p474_p5)
}
  0xfa   : > { %s478_s30 = scalar_lea.hbm %s638_s23, 256  ;;  %s482_s6 = scalar_lea.hbm %s688_s3, 512 }
  0xfb   : > { %p479_p6 = scmp.ne.s32.totalorder %s638_s23, %s478_s30  ;;  %p483_p10 = scmp.lt.u32.totalorder %s638_s23, %s688_s3 }
  0xfc   : > { %p484_p11 = scmp.lt.u32.totalorder %s482_s6, %s478_s30  ;;  %p486_p13 = scmp.lt.u32.totalorder %s478_s30, %s638_s23 }
  0xfd   : > { %p480_p7 = pnand %p479_p6, %p607_p4 }
  0xfe   : > { %p485_p12 = por %p484_p11, %p483_p10 }
  0xff   : > { %p481_p9 = pneg %p480_p7 }
 0x100   : > { %p487_p0 = por %p486_p13, %p485_p12 }
 0x102   : > { %p488_p1 = pnand %p487_p0, %p481_p9 }
 0x104   : > { %491 = shalt.err (!%p488_p1)
}
 0x105   : > { %405 = dma.vmem_to_hbm [thread:$0]  (%p607_p4), %s640_s18, 256, %s638_s23, %s295_s26  }
 0x106 PF: > { %p411_p2 = scmp.ge.s32.totalorder %s542_s17, 2  ;;  %s323_s9 = sand.u32 1, %s522_s12  }
 0x107   : > { %s324_s10 = scalar_lea.sflag [#allocation3], %s323_s9 }
 0x108   : > { %p408_p3 = pnand %p411_p2, %p614_p8 }
 0x10a   : > { %517 = dma.done.wait (!%p408_p3), %s324_s10, 256  }
 0x10b   : > { %519 = vsyncadd (!%p408_p3), %s324_s10, 4294967040  ;;  %s16_s17 = sadd.s32 1, %s542_s17   ;;  %s691_s12 = smov %s526_s13 }
 0x10c   : > { %p13_p5 = scmp.ge.s32.totalorder %s16_s17, 4   ;;  %s692_s13 = smov %s530_s14 }
 0x10d   : > { %s693_s14 = smov %s620_s25  ;;  %s694_s15 = smov %s538_s16 }
 0x10e   : > { %s695_s16 = smov %s697_s20  ;;  %15 = sbr.rel (!%p13_p5) target bundleno = 4 (0x4), region = 67 }
 0x115   :  { %329 = vsyncpa [#allocation3], 1 }
 0x116   :  { %331 = vsyncpa [#allocation3 + $0x1], 1 }

</bundles_post_ra>
